<compile_context>
chip_gen: v7x
topology: tpu7x:2x2x1
jax: 0.10.0
libtpu: 0.0.40
codegen_flags: <defaults>
</compile_context>

<pallas_src>
import functools
import math

import jax
import jax.numpy as jnp
import numpy as np
from jax import lax
from jax.experimental import pallas as pl
from jax.experimental.pallas import tpu as pltpu

NUM_HEADS = 2


def _mha_kernel(q_ref, k_ref, v_ref, w_in_ref, b_in_ref, wo_ref, bo_ref,
                out_ref, attnw_ref, *, n_batch, embed_dim, compute_dtype):
    """Fused MHA forward for all batch elements in a single grid step.

    q_ref: (L, N*E)   k_ref/v_ref: (S, N*E)   (seq-first, batch folded into lanes)
    w_in_ref: (3*H, E, hd)   b_in_ref: (3*H, 1, hd)
    wo_ref: (H, hd, E)       bo_ref: (1, E)
    out_ref: (L, N*E)        attnw_ref: (N*L, S)
    """
    E = embed_dim
    H = NUM_HEADS
    cdt = compute_dtype

    # Load once; cast activations to the MXU operand dtype (f32 accumulation below).
    q_all = q_ref[...].astype(cdt)      # (L, N*E)
    k_all = k_ref[...].astype(cdt)      # (S, N*E)
    v_all = v_ref[...].astype(cdt)      # (S, N*E)
    bo = bo_ref[...]                    # (1, E) f32

    outs = []
    attnws = []
    for b in range(n_batch):                 # static unroll over batch
        q = q_all[:, b * E:(b + 1) * E]      # (L, E)
        k = k_all[:, b * E:(b + 1) * E]      # (S, E)
        v = v_all[:, b * E:(b + 1) * E]      # (S, E)

        out_acc = None
        w_acc = None
        for h in range(H):                   # static unroll over heads
            wq = w_in_ref[0 * H + h]         # (E, hd), pre-transposed, scale folded
            wk = w_in_ref[1 * H + h]
            wv = w_in_ref[2 * H + h]
            bq = b_in_ref[0 * H + h]         # (1, hd) f32, scale folded
            bk = b_in_ref[1 * H + h]
            bv = b_in_ref[2 * H + h]

            qh = jnp.dot(q, wq, preferred_element_type=jnp.float32) + bq   # (L, hd)
            kh = jnp.dot(k, wk, preferred_element_type=jnp.float32) + bk   # (S, hd)
            vh = jnp.dot(v, wv, preferred_element_type=jnp.float32) + bv   # (S, hd)

            # scores = (q * scale) @ k^T   (scale already folded into wq/bq)
            s = lax.dot_general(qh.astype(cdt), kh.astype(cdt),
                                (((1,), (1,)), ((), ())),
                                preferred_element_type=jnp.float32)        # (L, S)
            m = jnp.max(s, axis=-1, keepdims=True)
            e = jnp.exp(s - m)
            denom = jnp.sum(e, axis=-1, keepdims=True)
            p = e * pl.reciprocal(denom, approx=True)                      # (L, S)
            # TODO(synk): torch MultiheadAttention dropout(p=0.1) on `p` omitted
            # (eval-mode / deterministic semantics).

            o_h = jnp.dot(p.astype(cdt), vh.astype(cdt),
                          preferred_element_type=jnp.float32)              # (L, hd)
            out_h = jnp.dot(o_h.astype(cdt), wo_ref[h],
                            preferred_element_type=jnp.float32)            # (L, E)

            out_acc = out_h if out_acc is None else out_acc + out_h
            w_acc = p if w_acc is None else w_acc + p

        outs.append((out_acc + bo).astype(out_ref.dtype))
        attnws.append((w_acc * (1.0 / H)).astype(attnw_ref.dtype))

    # Single full-block stores: lane-concat for the output slab,
    # sublane-concat for the (head-averaged) attention weights.
    out_ref[...] = jnp.concatenate(outs, axis=-1)       # (L, N*E)
    attnw_ref[...] = jnp.concatenate(attnws, axis=0)    # (N*L, S)


def init_params(key, embed_dim):
    """torch.nn.MultiheadAttention-shaped parameters (in_proj 3E x E, out_proj E x E)."""
    k0, k1, k2, k3 = jax.random.split(key, 4)
    E = embed_dim
    in_proj_w = jax.random.normal(k0, (3 * E, E), jnp.float32) * 0.1
    in_proj_b = jax.random.normal(k1, (3 * E,), jnp.float32) * 0.1
    out_w = jax.random.normal(k2, (E, E), jnp.float32) * 0.1
    out_b = jax.random.normal(k3, (E,), jnp.float32) * 0.1
    return dict(
        wq=in_proj_w[0:E], wk=in_proj_w[E:2 * E], wv=in_proj_w[2 * E:3 * E],
        bq=in_proj_b[0:E], bk=in_proj_b[E:2 * E], bv=in_proj_b[2 * E:3 * E],
        wo=out_w, bo=out_b,
    )


def pack_params(params, compute_dtype=jnp.bfloat16):
    """Pre-transpose / pack per-head weights for the kernel (do once per model)."""
    E = params["wo"].shape[0]
    H = NUM_HEADS
    hd = E // H
    scale = 1.0 / math.sqrt(hd)

    def head_t(w, h):                       # (E_out, E_in) -> (E_in, hd) for head h
        return w[h * hd:(h + 1) * hd, :].T

    w_in = jnp.stack(
        [head_t(params["wq"], h) * scale for h in range(H)]
        + [head_t(params["wk"], h) for h in range(H)]
        + [head_t(params["wv"], h) for h in range(H)],
        axis=0).astype(compute_dtype)                                   # (3H, E, hd)
    b_in = jnp.stack(
        [params["bq"][h * hd:(h + 1) * hd] * scale for h in range(H)]
        + [params["bk"][h * hd:(h + 1) * hd] for h in range(H)]
        + [params["bv"][h * hd:(h + 1) * hd] for h in range(H)],
        axis=0).reshape(3 * H, 1, hd).astype(jnp.float32)               # (3H, 1, hd)
    wo_heads = jnp.stack(
        [params["wo"][:, h * hd:(h + 1) * hd].T for h in range(H)],
        axis=0).astype(compute_dtype)                                   # (H, hd, E)
    bo = params["bo"].reshape(1, E).astype(jnp.float32)                 # (1, E)
    return dict(w_in=w_in, b_in=b_in, wo_heads=wo_heads, bo=bo)


def target_attention(target_encoding, sentence_encoding, snippet_encoding, packed):
    """query=target (L,N,E), key=sentence (S,N,E), value=snippet (S,N,E).

    Returns (attn_output (L,N,E), attn_weights (N,L,S)) like torch MHA
    (batch_first=False, average_attn_weights=True, eval mode).
    """
    L, N, E = target_encoding.shape
    S = sentence_encoding.shape[0]
    dtype = target_encoding.dtype
    compute_dtype = packed["w_in"].dtype

    # Free row-major reshapes (no transposes, no copies): fold batch into lanes.
    q2 = target_encoding.reshape(L, N * E)
    k2 = sentence_encoding.reshape(S, N * E)
    v2 = snippet_encoding.reshape(S, N * E)

    kernel = functools.partial(_mha_kernel, n_batch=N, embed_dim=E,
                               compute_dtype=compute_dtype)

    def vmem():
        return pl.BlockSpec(memory_space=pltpu.MemorySpace.VMEM)

    out2, attnw2 = pl.pallas_call(
        kernel,
        out_shape=(jax.ShapeDtypeStruct((L, N * E), dtype),
                   jax.ShapeDtypeStruct((N * L, S), dtype)),
        in_specs=[vmem() for _ in range(7)],
        out_specs=(vmem(), vmem()),
        # NOTE: single grid step; all operands are tiny and live fully in VMEM.
        # For large N/L/S: tile the batch over a "parallel" grid axis (v7x has two
        # TensorCores) and budget VMEM via pltpu.CompilerParams(vmem_limit_bytes=...).
    )(q2, k2, v2, packed["w_in"], packed["b_in"], packed["wo_heads"], packed["bo"])

    attn_output = out2.reshape(L, N, E)      # free reshape, stays seq-first
    attn_weights = attnw2.reshape(N, L, S)   # free reshape
    return attn_output, attn_weights


def _reference_mha(target, sentence, snippet, params):
    """Pure-JAX f32 reference mirroring torch.nn.MultiheadAttention.forward (eval)."""
    L, N, E = target.shape
    S = sentence.shape[0]
    H = NUM_HEADS
    hd = E // H
    scale = 1.0 / math.sqrt(hd)

    q = jnp.einsum("lne,fe->lnf", target, params["wq"]) + params["bq"]
    k = jnp.einsum("sne,fe->snf", sentence, params["wk"]) + params["bk"]
    v = jnp.einsum("sne,fe->snf", snippet, params["wv"]) + params["bv"]

    qh = q.reshape(L, N, H, hd).transpose(1, 2, 0, 3) * scale    # (N,H,L,hd)
    kh = k.reshape(S, N, H, hd).transpose(1, 2, 0, 3)            # (N,H,S,hd)
    vh = v.reshape(S, N, H, hd).transpose(1, 2, 0, 3)

    s = jnp.einsum("nhld,nhsd->nhls", qh, kh)
    p = jax.nn.softmax(s, axis=-1)
    o = jnp.einsum("nhls,nhsd->nhld", p, vh)                     # (N,H,L,hd)
    o = o.transpose(2, 0, 1, 3).reshape(L, N, E)
    out = jnp.einsum("lne,fe->lnf", o, params["wo"]) + params["bo"]
    attnw = jnp.mean(p, axis=1)                                  # (N,L,S)
    return out, attnw


if __name__ == "__main__":
    key = jax.random.PRNGKey(0)
    k_q, k_k, k_v, k_p = jax.random.split(key, 4)

    hidden_dim = 32   # embed_dim (num_heads=2 -> head_dim=16)
    L, S, N = 8, 8, 2

    target_encoding = jax.random.normal(k_q, (L, N, hidden_dim), jnp.float32)
    sentence_encoding = jax.random.normal(k_k, (S, N, hidden_dim), jnp.float32)
    snippet_encoding = jax.random.normal(k_v, (S, N, hidden_dim), jnp.float32)

    params = init_params(k_p, hidden_dim)
    packed = pack_params(params, compute_dtype=jnp.bfloat16)

    fwd = jax.jit(target_attention)
    attn_output, attn_weights = fwd(target_encoding, sentence_encoding,
                                    snippet_encoding, packed)
    jax.block_until_ready((attn_output, attn_weights))

    assert attn_output.shape == (L, N, hidden_dim)
    assert attn_weights.shape == (N, L, S)

    ref_out, ref_w = _reference_mha(target_encoding, sentence_encoding,
                                    snippet_encoding, params)
    np.testing.assert_allclose(np.asarray(attn_output), np.asarray(ref_out),
                               atol=3e-2, rtol=3e-2)
    np.testing.assert_allclose(np.asarray(attn_weights), np.asarray(ref_w),
                               atol=3e-2, rtol=3e-2)
    print("KERNEL_OK")
</pallas_src>

<mosaic_0001>
module attributes {stable_mosaic.version = 11 : i64} {
  func.func @_mha_kernel(%arg0: memref<8x64xf32, #tpu.memory_space<vmem>>, %arg1: memref<8x64xf32, #tpu.memory_space<vmem>>, %arg2: memref<8x64xf32, #tpu.memory_space<vmem>>, %arg3: memref<6x32x16xbf16, #tpu.memory_space<vmem>>, %arg4: memref<6x1x16xf32, #tpu.memory_space<vmem>>, %arg5: memref<2x16x32xbf16, #tpu.memory_space<vmem>>, %arg6: memref<1x32xf32, #tpu.memory_space<vmem>>, %arg7: memref<8x64xf32, #tpu.memory_space<vmem>>, %arg8: memref<16x8xf32, #tpu.memory_space<vmem>>) attributes {dimension_semantics = [], scalar_prefetch = 0 : i64, scratch_operands = 0 : i64, tpu.core_type = #tpu.core_type<tc>} {
    %c0 = arith.constant 0 : index
    %c0_0 = arith.constant 0 : index
    %0 = vector.load %arg0[%c0, %c0_0] : memref<8x64xf32, #tpu.memory_space<vmem>>, vector<8x64xf32>
    %1 = arith.truncf %0 : vector<8x64xf32> to vector<8x64xbf16>
    %c0_1 = arith.constant 0 : index
    %c0_2 = arith.constant 0 : index
    %2 = vector.load %arg1[%c0_1, %c0_2] : memref<8x64xf32, #tpu.memory_space<vmem>>, vector<8x64xf32>
    %3 = arith.truncf %2 : vector<8x64xf32> to vector<8x64xbf16>
    %c0_3 = arith.constant 0 : index
    %c0_4 = arith.constant 0 : index
    %4 = vector.load %arg2[%c0_3, %c0_4] : memref<8x64xf32, #tpu.memory_space<vmem>>, vector<8x64xf32>
    %5 = arith.truncf %4 : vector<8x64xf32> to vector<8x64xbf16>
    %c0_5 = arith.constant 0 : index
    %c0_6 = arith.constant 0 : index
    %6 = vector.load %arg6[%c0_5, %c0_6] : memref<1x32xf32, #tpu.memory_space<vmem>>, vector<1x32xf32>
    %7 = vector.extract_strided_slice %1 {offsets = [0, 0], sizes = [8, 32], strides = [1, 1]} : vector<8x64xbf16> to vector<8x32xbf16>
    %8 = vector.extract_strided_slice %3 {offsets = [0, 0], sizes = [8, 32], strides = [1, 1]} : vector<8x64xbf16> to vector<8x32xbf16>
    %9 = vector.extract_strided_slice %5 {offsets = [0, 0], sizes = [8, 32], strides = [1, 1]} : vector<8x64xbf16> to vector<8x32xbf16>
    %c0_7 = arith.constant 0 : index
    %c0_8 = arith.constant 0 : index
    %c0_9 = arith.constant 0 : index
    %10 = vector.load %arg3[%c0_7, %c0_8, %c0_9] : memref<6x32x16xbf16, #tpu.memory_space<vmem>>, vector<1x32x16xbf16>
    %11 = vector.shape_cast %10 : vector<1x32x16xbf16> to vector<32x16xbf16>
    %c2 = arith.constant 2 : index
    %c0_10 = arith.constant 0 : index
    %c0_11 = arith.constant 0 : index
    %12 = vector.load %arg3[%c2, %c0_10, %c0_11] : memref<6x32x16xbf16, #tpu.memory_space<vmem>>, vector<1x32x16xbf16>
    %13 = vector.shape_cast %12 : vector<1x32x16xbf16> to vector<32x16xbf16>
    %c4 = arith.constant 4 : index
    %c0_12 = arith.constant 0 : index
    %c0_13 = arith.constant 0 : index
    %14 = vector.load %arg3[%c4, %c0_12, %c0_13] : memref<6x32x16xbf16, #tpu.memory_space<vmem>>, vector<1x32x16xbf16>
    %15 = vector.shape_cast %14 : vector<1x32x16xbf16> to vector<32x16xbf16>
    %c0_14 = arith.constant 0 : index
    %c0_15 = arith.constant 0 : index
    %c0_16 = arith.constant 0 : index
    %16 = vector.load %arg4[%c0_14, %c0_15, %c0_16] : memref<6x1x16xf32, #tpu.memory_space<vmem>>, vector<1x1x16xf32>
    %17 = vector.shape_cast %16 : vector<1x1x16xf32> to vector<1x16xf32>
    %c2_17 = arith.constant 2 : index
    %c0_18 = arith.constant 0 : index
    %c0_19 = arith.constant 0 : index
    %18 = vector.load %arg4[%c2_17, %c0_18, %c0_19] : memref<6x1x16xf32, #tpu.memory_space<vmem>>, vector<1x1x16xf32>
    %19 = vector.shape_cast %18 : vector<1x1x16xf32> to vector<1x16xf32>
    %c4_20 = arith.constant 4 : index
    %c0_21 = arith.constant 0 : index
    %c0_22 = arith.constant 0 : index
    %20 = vector.load %arg4[%c4_20, %c0_21, %c0_22] : memref<6x1x16xf32, #tpu.memory_space<vmem>>, vector<1x1x16xf32>
    %21 = vector.shape_cast %20 : vector<1x1x16xf32> to vector<1x16xf32>
    %cst = arith.constant dense<0.000000e+00> : vector<8x16xf32>
    %22 = tpu.matmul %7, %11, %cst {dimension_numbers = #tpu.dot_dimension_numbers<[1], [0], [0], [1], [0, 0, 1, 1], [], []>} : vector<8x32xbf16>, vector<32x16xbf16>, vector<8x16xf32> -> vector<8x16xf32>
    %23 = vector.broadcast %17 : vector<1x16xf32> to vector<8x16xf32>
    %24 = arith.addf %22, %23 : vector<8x16xf32>
    %cst_23 = arith.constant dense<0.000000e+00> : vector<8x16xf32>
    %25 = tpu.matmul %8, %13, %cst_23 {dimension_numbers = #tpu.dot_dimension_numbers<[1], [0], [0], [1], [0, 0, 1, 1], [], []>} : vector<8x32xbf16>, vector<32x16xbf16>, vector<8x16xf32> -> vector<8x16xf32>
    %26 = vector.broadcast %19 : vector<1x16xf32> to vector<8x16xf32>
    %27 = arith.addf %25, %26 : vector<8x16xf32>
    %cst_24 = arith.constant dense<0.000000e+00> : vector<8x16xf32>
    %28 = tpu.matmul %9, %15, %cst_24 {dimension_numbers = #tpu.dot_dimension_numbers<[1], [0], [0], [1], [0, 0, 1, 1], [], []>} : vector<8x32xbf16>, vector<32x16xbf16>, vector<8x16xf32> -> vector<8x16xf32>
    %29 = vector.broadcast %21 : vector<1x16xf32> to vector<8x16xf32>
    %30 = arith.addf %28, %29 : vector<8x16xf32>
    %31 = arith.truncf %24 : vector<8x16xf32> to vector<8x16xbf16>
    %32 = arith.truncf %27 : vector<8x16xf32> to vector<8x16xbf16>
    %cst_25 = arith.constant dense<0.000000e+00> : vector<8x8xf32>
    %33 = tpu.matmul %31, %32, %cst_25 {dimension_numbers = #tpu.dot_dimension_numbers<[1], [1], [0], [0], [0, 0, 1, 0], [], []>} : vector<8x16xbf16>, vector<8x16xbf16>, vector<8x8xf32> -> vector<8x8xf32>
    %cst_26 = arith.constant dense<0xFF800000> : vector<8xf32>
    %34 = vector.multi_reduction <maximumf>, %33, %cst_26 [1] : vector<8x8xf32> to vector<8xf32>
    %35 = vector.shape_cast %34 : vector<8xf32> to vector<8x1xf32>
    %36 = vector.broadcast %35 : vector<8x1xf32> to vector<8x8xf32>
    %37 = arith.subf %33, %36 : vector<8x8xf32>
    %38 = math.exp %37 : vector<8x8xf32>
    %cst_27 = arith.constant dense<0.000000e+00> : vector<8xf32>
    %39 = vector.multi_reduction <add>, %38, %cst_27 [1] : vector<8x8xf32> to vector<8xf32>
    %40 = vector.shape_cast %39 : vector<8xf32> to vector<8x1xf32>
    %41 = tpu.reciprocal %40 {approx = true} : vector<8x1xf32> -> vector<8x1xf32>
    %42 = vector.broadcast %41 : vector<8x1xf32> to vector<8x8xf32>
    %43 = arith.mulf %38, %42 : vector<8x8xf32>
    %44 = arith.truncf %43 : vector<8x8xf32> to vector<8x8xbf16>
    %45 = arith.truncf %30 : vector<8x16xf32> to vector<8x16xbf16>
    %cst_28 = arith.constant dense<0.000000e+00> : vector<8x16xf32>
    %46 = tpu.matmul %44, %45, %cst_28 {dimension_numbers = #tpu.dot_dimension_numbers<[1], [0], [0], [1], [0, 0, 1, 1], [], []>} : vector<8x8xbf16>, vector<8x16xbf16>, vector<8x16xf32> -> vector<8x16xf32>
    %47 = arith.truncf %46 : vector<8x16xf32> to vector<8x16xbf16>
    %c0_29 = arith.constant 0 : index
    %c0_30 = arith.constant 0 : index
    %c0_31 = arith.constant 0 : index
    %48 = vector.load %arg5[%c0_29, %c0_30, %c0_31] : memref<2x16x32xbf16, #tpu.memory_space<vmem>>, vector<1x16x32xbf16>
    %49 = vector.shape_cast %48 : vector<1x16x32xbf16> to vector<16x32xbf16>
    %cst_32 = arith.constant dense<0.000000e+00> : vector<8x32xf32>
    %50 = tpu.matmul %47, %49, %cst_32 {dimension_numbers = #tpu.dot_dimension_numbers<[1], [0], [0], [1], [0, 0, 1, 1], [], []>} : vector<8x16xbf16>, vector<16x32xbf16>, vector<8x32xf32> -> vector<8x32xf32>
    %c1 = arith.constant 1 : index
    %c0_33 = arith.constant 0 : index
    %c0_34 = arith.constant 0 : index
    %51 = vector.load %arg3[%c1, %c0_33, %c0_34] : memref<6x32x16xbf16, #tpu.memory_space<vmem>>, vector<1x32x16xbf16>
    %52 = vector.shape_cast %51 : vector<1x32x16xbf16> to vector<32x16xbf16>
    %c3 = arith.constant 3 : index
    %c0_35 = arith.constant 0 : index
    %c0_36 = arith.constant 0 : index
    %53 = vector.load %arg3[%c3, %c0_35, %c0_36] : memref<6x32x16xbf16, #tpu.memory_space<vmem>>, vector<1x32x16xbf16>
    %54 = vector.shape_cast %53 : vector<1x32x16xbf16> to vector<32x16xbf16>
    %c5 = arith.constant 5 : index
    %c0_37 = arith.constant 0 : index
    %c0_38 = arith.constant 0 : index
    %55 = vector.load %arg3[%c5, %c0_37, %c0_38] : memref<6x32x16xbf16, #tpu.memory_space<vmem>>, vector<1x32x16xbf16>
    %56 = vector.shape_cast %55 : vector<1x32x16xbf16> to vector<32x16xbf16>
    %c1_39 = arith.constant 1 : index
    %c0_40 = arith.constant 0 : index
    %c0_41 = arith.constant 0 : index
    %57 = vector.load %arg4[%c1_39, %c0_40, %c0_41] : memref<6x1x16xf32, #tpu.memory_space<vmem>>, vector<1x1x16xf32>
    %58 = vector.shape_cast %57 : vector<1x1x16xf32> to vector<1x16xf32>
    %c3_42 = arith.constant 3 : index
    %c0_43 = arith.constant 0 : index
    %c0_44 = arith.constant 0 : index
    %59 = vector.load %arg4[%c3_42, %c0_43, %c0_44] : memref<6x1x16xf32, #tpu.memory_space<vmem>>, vector<1x1x16xf32>
    %60 = vector.shape_cast %59 : vector<1x1x16xf32> to vector<1x16xf32>
    %c5_45 = arith.constant 5 : index
    %c0_46 = arith.constant 0 : index
    %c0_47 = arith.constant 0 : index
    %61 = vector.load %arg4[%c5_45, %c0_46, %c0_47] : memref<6x1x16xf32, #tpu.memory_space<vmem>>, vector<1x1x16xf32>
    %62 = vector.shape_cast %61 : vector<1x1x16xf32> to vector<1x16xf32>
    %cst_48 = arith.constant dense<0.000000e+00> : vector<8x16xf32>
    %63 = tpu.matmul %7, %52, %cst_48 {dimension_numbers = #tpu.dot_dimension_numbers<[1], [0], [0], [1], [0, 0, 1, 1], [], []>} : vector<8x32xbf16>, vector<32x16xbf16>, vector<8x16xf32> -> vector<8x16xf32>
    %64 = vector.broadcast %58 : vector<1x16xf32> to vector<8x16xf32>
    %65 = arith.addf %63, %64 : vector<8x16xf32>
    %cst_49 = arith.constant dense<0.000000e+00> : vector<8x16xf32>
    %66 = tpu.matmul %8, %54, %cst_49 {dimension_numbers = #tpu.dot_dimension_numbers<[1], [0], [0], [1], [0, 0, 1, 1], [], []>} : vector<8x32xbf16>, vector<32x16xbf16>, vector<8x16xf32> -> vector<8x16xf32>
    %67 = vector.broadcast %60 : vector<1x16xf32> to vector<8x16xf32>
    %68 = arith.addf %66, %67 : vector<8x16xf32>
    %cst_50 = arith.constant dense<0.000000e+00> : vector<8x16xf32>
    %69 = tpu.matmul %9, %56, %cst_50 {dimension_numbers = #tpu.dot_dimension_numbers<[1], [0], [0], [1], [0, 0, 1, 1], [], []>} : vector<8x32xbf16>, vector<32x16xbf16>, vector<8x16xf32> -> vector<8x16xf32>
    %70 = vector.broadcast %62 : vector<1x16xf32> to vector<8x16xf32>
    %71 = arith.addf %69, %70 : vector<8x16xf32>
    %72 = arith.truncf %65 : vector<8x16xf32> to vector<8x16xbf16>
    %73 = arith.truncf %68 : vector<8x16xf32> to vector<8x16xbf16>
    %cst_51 = arith.constant dense<0.000000e+00> : vector<8x8xf32>
    %74 = tpu.matmul %72, %73, %cst_51 {dimension_numbers = #tpu.dot_dimension_numbers<[1], [1], [0], [0], [0, 0, 1, 0], [], []>} : vector<8x16xbf16>, vector<8x16xbf16>, vector<8x8xf32> -> vector<8x8xf32>
    %cst_52 = arith.constant dense<0xFF800000> : vector<8xf32>
    %75 = vector.multi_reduction <maximumf>, %74, %cst_52 [1] : vector<8x8xf32> to vector<8xf32>
    %76 = vector.shape_cast %75 : vector<8xf32> to vector<8x1xf32>
    %77 = vector.broadcast %76 : vector<8x1xf32> to vector<8x8xf32>
    %78 = arith.subf %74, %77 : vector<8x8xf32>
    %79 = math.exp %78 : vector<8x8xf32>
    %cst_53 = arith.constant dense<0.000000e+00> : vector<8xf32>
    %80 = vector.multi_reduction <add>, %79, %cst_53 [1] : vector<8x8xf32> to vector<8xf32>
    %81 = vector.shape_cast %80 : vector<8xf32> to vector<8x1xf32>
    %82 = tpu.reciprocal %81 {approx = true} : vector<8x1xf32> -> vector<8x1xf32>
    %83 = vector.broadcast %82 : vector<8x1xf32> to vector<8x8xf32>
    %84 = arith.mulf %79, %83 : vector<8x8xf32>
    %85 = arith.truncf %84 : vector<8x8xf32> to vector<8x8xbf16>
    %86 = arith.truncf %71 : vector<8x16xf32> to vector<8x16xbf16>
    %cst_54 = arith.constant dense<0.000000e+00> : vector<8x16xf32>
    %87 = tpu.matmul %85, %86, %cst_54 {dimension_numbers = #tpu.dot_dimension_numbers<[1], [0], [0], [1], [0, 0, 1, 1], [], []>} : vector<8x8xbf16>, vector<8x16xbf16>, vector<8x16xf32> -> vector<8x16xf32>
    %88 = arith.truncf %87 : vector<8x16xf32> to vector<8x16xbf16>
    %c1_55 = arith.constant 1 : index
    %c0_56 = arith.constant 0 : index
    %c0_57 = arith.constant 0 : index
    %89 = vector.load %arg5[%c1_55, %c0_56, %c0_57] : memref<2x16x32xbf16, #tpu.memory_space<vmem>>, vector<1x16x32xbf16>
    %90 = vector.shape_cast %89 : vector<1x16x32xbf16> to vector<16x32xbf16>
    %cst_58 = arith.constant dense<0.000000e+00> : vector<8x32xf32>
    %91 = tpu.matmul %88, %90, %cst_58 {dimension_numbers = #tpu.dot_dimension_numbers<[1], [0], [0], [1], [0, 0, 1, 1], [], []>} : vector<8x16xbf16>, vector<16x32xbf16>, vector<8x32xf32> -> vector<8x32xf32>
    %92 = arith.addf %50, %91 : vector<8x32xf32>
    %93 = arith.addf %43, %84 : vector<8x8xf32>
    %94 = vector.broadcast %6 : vector<1x32xf32> to vector<8x32xf32>
    %95 = arith.addf %92, %94 : vector<8x32xf32>
    %cst_59 = arith.constant 5.000000e-01 : f32
    %96 = vector.broadcast %cst_59 : f32 to vector<8x8xf32>
    %97 = arith.mulf %93, %96 : vector<8x8xf32>
    %98 = vector.extract_strided_slice %1 {offsets = [0, 32], sizes = [8, 32], strides = [1, 1]} : vector<8x64xbf16> to vector<8x32xbf16>
    %99 = vector.extract_strided_slice %3 {offsets = [0, 32], sizes = [8, 32], strides = [1, 1]} : vector<8x64xbf16> to vector<8x32xbf16>
    %100 = vector.extract_strided_slice %5 {offsets = [0, 32], sizes = [8, 32], strides = [1, 1]} : vector<8x64xbf16> to vector<8x32xbf16>
    %c0_60 = arith.constant 0 : index
    %c0_61 = arith.constant 0 : index
    %c0_62 = arith.constant 0 : index
    %101 = vector.load %arg3[%c0_60, %c0_61, %c0_62] : memref<6x32x16xbf16, #tpu.memory_space<vmem>>, vector<1x32x16xbf16>
    %102 = vector.shape_cast %101 : vector<1x32x16xbf16> to vector<32x16xbf16>
    %c2_63 = arith.constant 2 : index
    %c0_64 = arith.constant 0 : index
    %c0_65 = arith.constant 0 : index
    %103 = vector.load %arg3[%c2_63, %c0_64, %c0_65] : memref<6x32x16xbf16, #tpu.memory_space<vmem>>, vector<1x32x16xbf16>
    %104 = vector.shape_cast %103 : vector<1x32x16xbf16> to vector<32x16xbf16>
    %c4_66 = arith.constant 4 : index
    %c0_67 = arith.constant 0 : index
    %c0_68 = arith.constant 0 : index
    %105 = vector.load %arg3[%c4_66, %c0_67, %c0_68] : memref<6x32x16xbf16, #tpu.memory_space<vmem>>, vector<1x32x16xbf16>
    %106 = vector.shape_cast %105 : vector<1x32x16xbf16> to vector<32x16xbf16>
    %c0_69 = arith.constant 0 : index
    %c0_70 = arith.constant 0 : index
    %c0_71 = arith.constant 0 : index
    %107 = vector.load %arg4[%c0_69, %c0_70, %c0_71] : memref<6x1x16xf32, #tpu.memory_space<vmem>>, vector<1x1x16xf32>
    %108 = vector.shape_cast %107 : vector<1x1x16xf32> to vector<1x16xf32>
    %c2_72 = arith.constant 2 : index
    %c0_73 = arith.constant 0 : index
    %c0_74 = arith.constant 0 : index
    %109 = vector.load %arg4[%c2_72, %c0_73, %c0_74] : memref<6x1x16xf32, #tpu.memory_space<vmem>>, vector<1x1x16xf32>
    %110 = vector.shape_cast %109 : vector<1x1x16xf32> to vector<1x16xf32>
    %c4_75 = arith.constant 4 : index
    %c0_76 = arith.constant 0 : index
    %c0_77 = arith.constant 0 : index
    %111 = vector.load %arg4[%c4_75, %c0_76, %c0_77] : memref<6x1x16xf32, #tpu.memory_space<vmem>>, vector<1x1x16xf32>
    %112 = vector.shape_cast %111 : vector<1x1x16xf32> to vector<1x16xf32>
    %cst_78 = arith.constant dense<0.000000e+00> : vector<8x16xf32>
    %113 = tpu.matmul %98, %102, %cst_78 {dimension_numbers = #tpu.dot_dimension_numbers<[1], [0], [0], [1], [0, 0, 1, 1], [], []>} : vector<8x32xbf16>, vector<32x16xbf16>, vector<8x16xf32> -> vector<8x16xf32>
    %114 = vector.broadcast %108 : vector<1x16xf32> to vector<8x16xf32>
    %115 = arith.addf %113, %114 : vector<8x16xf32>
    %cst_79 = arith.constant dense<0.000000e+00> : vector<8x16xf32>
    %116 = tpu.matmul %99, %104, %cst_79 {dimension_numbers = #tpu.dot_dimension_numbers<[1], [0], [0], [1], [0, 0, 1, 1], [], []>} : vector<8x32xbf16>, vector<32x16xbf16>, vector<8x16xf32> -> vector<8x16xf32>
    %117 = vector.broadcast %110 : vector<1x16xf32> to vector<8x16xf32>
    %118 = arith.addf %116, %117 : vector<8x16xf32>
    %cst_80 = arith.constant dense<0.000000e+00> : vector<8x16xf32>
    %119 = tpu.matmul %100, %106, %cst_80 {dimension_numbers = #tpu.dot_dimension_numbers<[1], [0], [0], [1], [0, 0, 1, 1], [], []>} : vector<8x32xbf16>, vector<32x16xbf16>, vector<8x16xf32> -> vector<8x16xf32>
    %120 = vector.broadcast %112 : vector<1x16xf32> to vector<8x16xf32>
    %121 = arith.addf %119, %120 : vector<8x16xf32>
    %122 = arith.truncf %115 : vector<8x16xf32> to vector<8x16xbf16>
    %123 = arith.truncf %118 : vector<8x16xf32> to vector<8x16xbf16>
    %cst_81 = arith.constant dense<0.000000e+00> : vector<8x8xf32>
    %124 = tpu.matmul %122, %123, %cst_81 {dimension_numbers = #tpu.dot_dimension_numbers<[1], [1], [0], [0], [0, 0, 1, 0], [], []>} : vector<8x16xbf16>, vector<8x16xbf16>, vector<8x8xf32> -> vector<8x8xf32>
    %cst_82 = arith.constant dense<0xFF800000> : vector<8xf32>
    %125 = vector.multi_reduction <maximumf>, %124, %cst_82 [1] : vector<8x8xf32> to vector<8xf32>
    %126 = vector.shape_cast %125 : vector<8xf32> to vector<8x1xf32>
    %127 = vector.broadcast %126 : vector<8x1xf32> to vector<8x8xf32>
    %128 = arith.subf %124, %127 : vector<8x8xf32>
    %129 = math.exp %128 : vector<8x8xf32>
    %cst_83 = arith.constant dense<0.000000e+00> : vector<8xf32>
    %130 = vector.multi_reduction <add>, %129, %cst_83 [1] : vector<8x8xf32> to vector<8xf32>
    %131 = vector.shape_cast %130 : vector<8xf32> to vector<8x1xf32>
    %132 = tpu.reciprocal %131 {approx = true} : vector<8x1xf32> -> vector<8x1xf32>
    %133 = vector.broadcast %132 : vector<8x1xf32> to vector<8x8xf32>
    %134 = arith.mulf %129, %133 : vector<8x8xf32>
    %135 = arith.truncf %134 : vector<8x8xf32> to vector<8x8xbf16>
    %136 = arith.truncf %121 : vector<8x16xf32> to vector<8x16xbf16>
    %cst_84 = arith.constant dense<0.000000e+00> : vector<8x16xf32>
    %137 = tpu.matmul %135, %136, %cst_84 {dimension_numbers = #tpu.dot_dimension_numbers<[1], [0], [0], [1], [0, 0, 1, 1], [], []>} : vector<8x8xbf16>, vector<8x16xbf16>, vector<8x16xf32> -> vector<8x16xf32>
    %138 = arith.truncf %137 : vector<8x16xf32> to vector<8x16xbf16>
    %c0_85 = arith.constant 0 : index
    %c0_86 = arith.constant 0 : index
    %c0_87 = arith.constant 0 : index
    %139 = vector.load %arg5[%c0_85, %c0_86, %c0_87] : memref<2x16x32xbf16, #tpu.memory_space<vmem>>, vector<1x16x32xbf16>
    %140 = vector.shape_cast %139 : vector<1x16x32xbf16> to vector<16x32xbf16>
    %cst_88 = arith.constant dense<0.000000e+00> : vector<8x32xf32>
    %141 = tpu.matmul %138, %140, %cst_88 {dimension_numbers = #tpu.dot_dimension_numbers<[1], [0], [0], [1], [0, 0, 1, 1], [], []>} : vector<8x16xbf16>, vector<16x32xbf16>, vector<8x32xf32> -> vector<8x32xf32>
    %c1_89 = arith.constant 1 : index
    %c0_90 = arith.constant 0 : index
    %c0_91 = arith.constant 0 : index
    %142 = vector.load %arg3[%c1_89, %c0_90, %c0_91] : memref<6x32x16xbf16, #tpu.memory_space<vmem>>, vector<1x32x16xbf16>
    %143 = vector.shape_cast %142 : vector<1x32x16xbf16> to vector<32x16xbf16>
    %c3_92 = arith.constant 3 : index
    %c0_93 = arith.constant 0 : index
    %c0_94 = arith.constant 0 : index
    %144 = vector.load %arg3[%c3_92, %c0_93, %c0_94] : memref<6x32x16xbf16, #tpu.memory_space<vmem>>, vector<1x32x16xbf16>
    %145 = vector.shape_cast %144 : vector<1x32x16xbf16> to vector<32x16xbf16>
    %c5_95 = arith.constant 5 : index
    %c0_96 = arith.constant 0 : index
    %c0_97 = arith.constant 0 : index
    %146 = vector.load %arg3[%c5_95, %c0_96, %c0_97] : memref<6x32x16xbf16, #tpu.memory_space<vmem>>, vector<1x32x16xbf16>
    %147 = vector.shape_cast %146 : vector<1x32x16xbf16> to vector<32x16xbf16>
    %c1_98 = arith.constant 1 : index
    %c0_99 = arith.constant 0 : index
    %c0_100 = arith.constant 0 : index
    %148 = vector.load %arg4[%c1_98, %c0_99, %c0_100] : memref<6x1x16xf32, #tpu.memory_space<vmem>>, vector<1x1x16xf32>
    %149 = vector.shape_cast %148 : vector<1x1x16xf32> to vector<1x16xf32>
    %c3_101 = arith.constant 3 : index
    %c0_102 = arith.constant 0 : index
    %c0_103 = arith.constant 0 : index
    %150 = vector.load %arg4[%c3_101, %c0_102, %c0_103] : memref<6x1x16xf32, #tpu.memory_space<vmem>>, vector<1x1x16xf32>
    %151 = vector.shape_cast %150 : vector<1x1x16xf32> to vector<1x16xf32>
    %c5_104 = arith.constant 5 : index
    %c0_105 = arith.constant 0 : index
    %c0_106 = arith.constant 0 : index
    %152 = vector.load %arg4[%c5_104, %c0_105, %c0_106] : memref<6x1x16xf32, #tpu.memory_space<vmem>>, vector<1x1x16xf32>
    %153 = vector.shape_cast %152 : vector<1x1x16xf32> to vector<1x16xf32>
    %cst_107 = arith.constant dense<0.000000e+00> : vector<8x16xf32>
    %154 = tpu.matmul %98, %143, %cst_107 {dimension_numbers = #tpu.dot_dimension_numbers<[1], [0], [0], [1], [0, 0, 1, 1], [], []>} : vector<8x32xbf16>, vector<32x16xbf16>, vector<8x16xf32> -> vector<8x16xf32>
    %155 = vector.broadcast %149 : vector<1x16xf32> to vector<8x16xf32>
    %156 = arith.addf %154, %155 : vector<8x16xf32>
    %cst_108 = arith.constant dense<0.000000e+00> : vector<8x16xf32>
    %157 = tpu.matmul %99, %145, %cst_108 {dimension_numbers = #tpu.dot_dimension_numbers<[1], [0], [0], [1], [0, 0, 1, 1], [], []>} : vector<8x32xbf16>, vector<32x16xbf16>, vector<8x16xf32> -> vector<8x16xf32>
    %158 = vector.broadcast %151 : vector<1x16xf32> to vector<8x16xf32>
    %159 = arith.addf %157, %158 : vector<8x16xf32>
    %cst_109 = arith.constant dense<0.000000e+00> : vector<8x16xf32>
    %160 = tpu.matmul %100, %147, %cst_109 {dimension_numbers = #tpu.dot_dimension_numbers<[1], [0], [0], [1], [0, 0, 1, 1], [], []>} : vector<8x32xbf16>, vector<32x16xbf16>, vector<8x16xf32> -> vector<8x16xf32>
    %161 = vector.broadcast %153 : vector<1x16xf32> to vector<8x16xf32>
    %162 = arith.addf %160, %161 : vector<8x16xf32>
    %163 = arith.truncf %156 : vector<8x16xf32> to vector<8x16xbf16>
    %164 = arith.truncf %159 : vector<8x16xf32> to vector<8x16xbf16>
    %cst_110 = arith.constant dense<0.000000e+00> : vector<8x8xf32>
    %165 = tpu.matmul %163, %164, %cst_110 {dimension_numbers = #tpu.dot_dimension_numbers<[1], [1], [0], [0], [0, 0, 1, 0], [], []>} : vector<8x16xbf16>, vector<8x16xbf16>, vector<8x8xf32> -> vector<8x8xf32>
    %cst_111 = arith.constant dense<0xFF800000> : vector<8xf32>
    %166 = vector.multi_reduction <maximumf>, %165, %cst_111 [1] : vector<8x8xf32> to vector<8xf32>
    %167 = vector.shape_cast %166 : vector<8xf32> to vector<8x1xf32>
    %168 = vector.broadcast %167 : vector<8x1xf32> to vector<8x8xf32>
    %169 = arith.subf %165, %168 : vector<8x8xf32>
    %170 = math.exp %169 : vector<8x8xf32>
    %cst_112 = arith.constant dense<0.000000e+00> : vector<8xf32>
    %171 = vector.multi_reduction <add>, %170, %cst_112 [1] : vector<8x8xf32> to vector<8xf32>
    %172 = vector.shape_cast %171 : vector<8xf32> to vector<8x1xf32>
    %173 = tpu.reciprocal %172 {approx = true} : vector<8x1xf32> -> vector<8x1xf32>
    %174 = vector.broadcast %173 : vector<8x1xf32> to vector<8x8xf32>
    %175 = arith.mulf %170, %174 : vector<8x8xf32>
    %176 = arith.truncf %175 : vector<8x8xf32> to vector<8x8xbf16>
    %177 = arith.truncf %162 : vector<8x16xf32> to vector<8x16xbf16>
    %cst_113 = arith.constant dense<0.000000e+00> : vector<8x16xf32>
    %178 = tpu.matmul %176, %177, %cst_113 {dimension_numbers = #tpu.dot_dimension_numbers<[1], [0], [0], [1], [0, 0, 1, 1], [], []>} : vector<8x8xbf16>, vector<8x16xbf16>, vector<8x16xf32> -> vector<8x16xf32>
    %179 = arith.truncf %178 : vector<8x16xf32> to vector<8x16xbf16>
    %c1_114 = arith.constant 1 : index
    %c0_115 = arith.constant 0 : index
    %c0_116 = arith.constant 0 : index
    %180 = vector.load %arg5[%c1_114, %c0_115, %c0_116] : memref<2x16x32xbf16, #tpu.memory_space<vmem>>, vector<1x16x32xbf16>
    %181 = vector.shape_cast %180 : vector<1x16x32xbf16> to vector<16x32xbf16>
    %cst_117 = arith.constant dense<0.000000e+00> : vector<8x32xf32>
    %182 = tpu.matmul %179, %181, %cst_117 {dimension_numbers = #tpu.dot_dimension_numbers<[1], [0], [0], [1], [0, 0, 1, 1], [], []>} : vector<8x16xbf16>, vector<16x32xbf16>, vector<8x32xf32> -> vector<8x32xf32>
    %183 = arith.addf %141, %182 : vector<8x32xf32>
    %184 = arith.addf %134, %175 : vector<8x8xf32>
    %185 = vector.broadcast %6 : vector<1x32xf32> to vector<8x32xf32>
    %186 = arith.addf %183, %185 : vector<8x32xf32>
    %cst_118 = arith.constant 5.000000e-01 : f32
    %187 = vector.broadcast %cst_118 : f32 to vector<8x8xf32>
    %188 = arith.mulf %184, %187 : vector<8x8xf32>
    %189 = tpu.concatenate %95, %186 in 1 : vector<8x32xf32>, vector<8x32xf32> -> vector<8x64xf32>
    %c0_119 = arith.constant 0 : index
    %c0_120 = arith.constant 0 : index
    %190 = vector.load %arg7[%c0_119, %c0_120] : memref<8x64xf32, #tpu.memory_space<vmem>>, vector<8x64xf32>
    tpu.vector_store %arg7[%c0_119, %c0_120], %189 {strides = array<i32>} : memref<8x64xf32, #tpu.memory_space<vmem>>, vector<8x64xf32>,
    %191 = tpu.concatenate %97, %188 in 0 : vector<8x8xf32>, vector<8x8xf32> -> vector<16x8xf32>
    %c0_121 = arith.constant 0 : index
    %c0_122 = arith.constant 0 : index
    %192 = vector.load %arg8[%c0_121, %c0_122] : memref<16x8xf32, #tpu.memory_space<vmem>>, vector<16x8xf32>
    tpu.vector_store %arg8[%c0_121, %c0_122], %191 {strides = array<i32>} : memref<16x8xf32, #tpu.memory_space<vmem>>, vector<16x8xf32>,
    return
  }
}

</mosaic_0001>

<bundles_post_ra>
// kernel: target_attention.1
= control target key start
LH: loop header
LB: loop body
LE: loop exit
PB: predicated region body
PF: predicated region fallthrough
CT: control target
= control target key end

     0   :  { %v1719_v1 = vmov 0.0   ;;  %vm1720_vm0 = vmmov 0   ;;  %vm74_vm1 = vcmask 261120   ;;  %s2096_s0 = inlined_call_operand.vmem [shape: f32[8,64], index: 0, kind: input, shape index: {}]   ;;  %s2097_s1 = inlined_call_operand.vmem [shape: f32[8,64], index: 1, kind: input, shape index: {}]   ;;  %s2098_s2 = inlined_call_operand.vmem [shape: f32[8,64], index: 2, kind: input, shape index: {}]   ;;  %s2099_s3 = inlined_call_operand.vmem [shape: bf16[6,32,16], index: 3, kind: input, shape index: {}]   ;;  %s2100_s4 = inlined_call_operand.vmem [shape: f32[6,1,16], index: 4, kind: input, shape index: {}]   ;;  %s2101_s5 = inlined_call_operand.vmem [shape: bf16[2,16,32], index: 5, kind: input, shape index: {}]   ;;  %s2102_s6 = inlined_call_operand.vmem [shape: f32[1,32], index: 6, kind: input, shape index: {}]   ;;  %s2103_s7 = inlined_call_operand.vmem [shape: f32[8,64], index: 7, kind: output, shape index: {0}]   ;;  %s2104_s8 = inlined_call_operand.hbm [shape: f32[16,8], index: 8, kind: output, shape index: {1}]  }
   0x1   :  { %v1774_v0 = vld [vmem:[%s2099_s3 + $0x20] sm:$0xff]   ;;  %1498 = vmatprep.subr.bf16.mxu1 %v1719_v1  ;;  %1490 = vmatprep.subr.bf16.mxu0 %v1719_v1  ;;  %v1781_v2 = vld [vmem:[%s2099_s3 + $0x28] sm:$0xff]  }
   0x2   :  { %1499 = vmatpush3.bf16.msra.mxu1 %v1774_v0  ;;  %v1787_v3 = vld [vmem:[%s2099_s3] sm:$0xff]   ;;  %1502 = vmatprep.mubr.msk.bf16.mxu1 %vm1720_vm0, %v1719_v1  ;;  %v1801_v5 = vld [vmem:[%s2099_s3 + $0x8] sm:$0xff]  }
   0x3   :  { %1500 = vmatprep.subr.bf16.mxu1 %v1719_v1  ;;  %v32_v4 = vld [vmem:[%s2097_s1] sm:$0xff]  ;;  %1494 = vmatprep.mubr.msk.bf16.mxu0 %vm1720_vm0, %v1719_v1 }
   0x4   :  { %1491 = vmatpush3.bf16.msra.mxu0 %v1787_v3  ;;  %v30_v6 = vld [vmem:[%s2096_s0] sm:$0xff]  ;;  %v1806_v7 = vpack.c.bf16 %v32_v4, %v32_v4 }
   0x5   :  { %1492 = vmatprep.subr.bf16.mxu0 %v1719_v1  ;;  %v1810_v8 = vpack.c.bf16 %v30_v6, %v30_v6 }
   0x6   :  { %1501 = vmatpush3.bf16.msra.mxu1 %v1781_v2 }
   0x7   :  { %1514 = vmatprep.subr.bf16.mxu1 %v1719_v1 }
   0x8   :  { %1493 = vmatpush3.bf16.msra.mxu0 %v1801_v5 }
   0x9   :  { %1503 = vmatmul.mubr.msk.bf16.vlgmr.msra.gmra.mrb[0].mxu1 %vm74_vm1, %v1806_v7  ;;  %1506 = vmatprep.subr.bf16.mxu0 %v1719_v1 }
   0xa   :  { %1516 = vmatprep.mubr.msk.bf16.mxu1 %vm1720_vm0, %v1719_v1 }
   0xb   :  { %1495 = vmatmul.mubr.msk.bf16.vlgmr.msra.gmra.mrb[0].mxu0 %vm74_vm1, %v1810_v8 }
   0xc   :  { %14 = vsyncpa [#allocation3], 0  ;;  %1510 = vmatprep.mubr.msk.bf16.mxu0 %vm1720_vm0, %v1719_v1  ;;  %v1826_v9 = vld [vmem:[%s2100_s4 + $0x2] ss:$0 sm:$0xff]  ;;  %vm242_vm2 = vcmask 130048   ;;  %v1849_v25 = vld [vmem:[%s2099_s3 + $0x48] sm:$0xff]  }
   0xd   :  { %v1832_v14 = vld [vmem:[%s2100_s4] ss:$0 sm:$0xff]  ;;  %vm289_vm3 = vcmask 64512   ;;  %v1868_v41 = vld [vmem:[%s2100_s4 + $0x4] ss:$0 sm:$0xff]  ;;  %vm306_vm4 = vcmask 1043456  }
   0xe   :  { %v1843_v24 = vld [vmem:[%s2099_s3 + $0x40] sm:$0xff]   ;;  %v1876_v46 = vld [vmem:[%s2099_s3 + $0x10] sm:$0xff]   ;;  %v1883_v47 = vld [vmem:[%s2099_s3 + $0x18] sm:$0xff]  }
   0xf   :  { %1507 = vmatpush3.bf16.msra.mxu0 %v1843_v24  ;;  %v34_v26 = vld [vmem:[%s2098_s2] sm:$0xff]  ;;  %v1896_v51 = vld [vmem:[%s2099_s3 + $0x30] sm:$0xff]   ;;  %v1905_v53 = vld [vmem:[%s2099_s3 + $0x38] sm:$0xff]  }
  0x10   :  { %1508 = vmatprep.subr.bf16.mxu0 %v1719_v1  ;;  %v1855_v27 = vpack.c.bf16 %v34_v26, %v34_v26  ;;  %v1921_v62 = vld [vmem:[%s2100_s4 + $0x3] ss:$0 sm:$0xff] }
  0x13   :  { %1509 = vmatpush3.bf16.msra.mxu0 %v1849_v25 }
  0x14   :  { %1520 = vmatprep.subr.bf16.mxu0 %v1719_v1 }
  0x16   :  { %1511 = vmatmul.mubr.msk.bf16.vlgmr.msra.gmra.mrb[4].mxu0 %vm74_vm1, %v1855_v27 }
  0x17   :  { %1522 = vmatprep.mubr.msk.bf16.mxu0 %vm1720_vm0, %v1719_v1 }
  0xdc   :  { %v173_v10 = vpop.f32.mrb[0].mxu1 }
  0xdd   :  { %v174_v11 = vadd.f32 %v1826_v9, %v173_v10  ;;  %v1504_v12 = vpop.f32.mrb[1].mxu1 }
  0xde   :  { %v176_v13 = vpop.f32.mrb[2].mxu1  ;;  %v112_v15 = vpop.f32.mrb[0].mxu0 }
  0xdf   :  { %v241_v16 = vpack.c.bf16 %v174_v11, %v174_v11  ;;  %v1505_v17 = vpop.f32.mrb[3].mxu1  ;;  %v1496_v18 = vpop.f32.mrb[1].mxu0  ;;  %v113_v21 = vadd.f32 %v1832_v14, %v112_v15  ;;  %v1927_v11 = vld [vmem:[%s2100_s4 + $0x1] ss:$0 sm:$0xff] }
  0xe0   :  { %v115_v19 = vpop.f32.mrb[2].mxu0  ;;  %v1938_v18 = vld [vmem:[%s2099_s3 + $0x50] sm:$0xff]  }
  0xe1   :  { %v247_v20 = vsel %vm242_vm2, %v241_v16, 0  ;;  %v1497_v22 = vpop.f32.mrb[3].mxu0  ;;  %v240_v23 = vpack.c.bf16 %v113_v21, %v113_v21  ;;  %v1944_v19 = vld [vmem:[%s2099_s3 + $0x58] sm:$0xff]  }
  0xe2   :  { %1515 = vmatpush3.bf16.xpose.msra.mxu1 %v247_v20 }
  0xe3   :  { %1526 = vmatprep.subr.bf16.mxu1 %v1719_v1 }
  0xe9   :  { %1517 = vmatmul.mubr.msk.bf16.vlgmr.msra.gmra.mrb[4].mxu1 %vm242_vm2, %v240_v23  ;;  %v234_v38 = vpop.f32.mrb[4].mxu0 }
  0xea   :  { %1530 = vmatprep.mubr.msk.bf16.mxu1 %vm1720_vm0, %v1719_v1  ;;  %v1512_v39 = vpop.f32.mrb[5].mxu0  ;;  %v235_v43 = vadd.f32 %v1868_v41, %v234_v38  ;;  %1527 = vmatpush3.bf16.msra.mxu1 %v1876_v46 }
  0xeb   :  { %v237_v40 = vpop.f32.mrb[6].mxu0  ;;  %1528 = vmatprep.subr.bf16.mxu1 %v1719_v1 }
  0xec   :  { %v1513_v42 = vpop.f32.mrb[7].mxu0  ;;  %v302_v44 = vpack.c.bf16 %v235_v43, %v235_v43 }
  0xed   :  { %v1968_v42 = vld [vmem:[%s2101_s5 + $0x8] sm:$0xff]  }
  0xee   :  { %v308_v45 = vsel %vm306_vm4, %v302_v44, 0  ;;  %1529 = vmatpush3.bf16.msra.mxu1 %v1883_v47 }
  0xef   :  { %1521 = vmatpush3.bf16.msra.mxu0 %v308_v45  ;;  %1542 = vmatprep.subr.bf16.mxu1 %v1719_v1 }
  0xf0   :  { %1534 = vmatprep.subr.bf16.mxu0 %v1719_v1 }
  0xf1   :  { %1531 = vmatmul.mubr.msk.bf16.vlgmr.msra.gmra.mrb[8].mxu1 %vm74_vm1, %v1810_v8 }
  0xf2   :  { %1546 = vmatprep.mubr.msk.bf16.mxu1 %vm1720_vm0, %v1719_v1  ;;  %1543 = vmatpush3.bf16.msra.mxu1 %v1938_v18 }
  0xf3   :  { %1544 = vmatprep.subr.bf16.mxu1 %v1719_v1 }
  0xf6   :  { %1545 = vmatpush3.bf16.msra.mxu1 %v1944_v19 }
  0xf7   :  { %1556 = vmatprep.subr.bf16.mxu1 %v1719_v1 }
  0xf9   :  { %1547 = vmatmul.mubr.msk.bf16.vlgmr.msra.gmra.mrb[12].mxu1 %vm74_vm1, %v1855_v27 }
  0xfa   :  { %1558 = vmatprep.mubr.msk.bf16.mxu1 %vm1720_vm0, %v1719_v1 }
 0x1bc   :  { %v283_v28 = vpop.f32.mrb[4].mxu1 }
 0x1bd   :  { %v1518_v29 = vpop.f32.mrb[5].mxu1  ;;  %v290_v30 = vsel %vm289_vm3, %v283_v28, -inf }
 0x1be   :  { %291 = vmax.xlane.f32.xlu0 %v290_v30  ;;  %v286_v31 = vpop.f32.mrb[6].mxu1 }
 0x1bf   :  { %v1519_v32 = vpop.f32.mrb[7].mxu1 }
 0x1c4   :  { %v426_v54 = vpop.f32.mrb[8].mxu1 }
 0x1c5   :  { %v1532_v55 = vpop.f32.mrb[9].mxu1  ;;  %v427_v16 = vadd.f32 %v1927_v11, %v426_v54 }
 0x1c6   :  { %v429_v56 = vpop.f32.mrb[10].mxu1 }
 0x1c7   :  { %v1533_v57 = vpop.f32.mrb[11].mxu1  ;;  %v548_v17 = vpack.c.bf16 %v427_v16, %v427_v16 }
 0x1cc   :  { %v542_v29 = vpop.f32.mrb[12].mxu1 }
 0x1cd   :  { %v1548_v31 = vpop.f32.mrb[13].mxu1 }
 0x1ce   :  { %v545_v32 = vpop.f32.mrb[14].mxu1 }
 0x24b   :  { %v292_v33 = vpop.xlane.xlu0 %291 }
 0x24c   :  { %v293_v34 = vsub.f32 %v283_v28, %v292_v33  ;;  %v1957_v28 = vld [vmem:[%s2100_s4 + $0x5] ss:$0 sm:$0xff]  ;;  %s1721_s4 = smov 96  }
 0x24d   :  { %v543_v30 = vadd.f32 %v1957_v28, %v542_v29 }
 0x24e   :  { %v294_v35 = vmul.f32 1.442695, %v293_v34  ;;  %v1549_v34 = vpop.f32.mrb[15].mxu1 }
 0x24f   :  { %v608_v33 = vpack.c.bf16 %v543_v30, %v543_v30 }
 0x250   :  { %1679 = vpow2.f32 %v294_v35 }
 0x251   :  { %v613_v35 = vsel %vm306_vm4, %v608_v33, 0 }
 0x252   :  { %1557 = vmatpush3.bf16.msra.mxu1 %v613_v35 }
 0x253   :  { %1568 = vmatprep.subr.bf16.mxu1 %v1719_v1 }
 0x25a   :  { %v1680_v36 = vpop.eup %1679 }
 0x25b   :  { %v296_v37 = vsel %vm289_vm3, %v1680_v36, 0.0 }
 0x25c   :  { %297 = vadd.xlane.f32.xlu0 %v296_v37 }
 0x272   :  { %813 = vrot.lane.b32.xlu0 %v1806_v7, %s1721_s4 }
 0x2e9   :  { %v298_v48 = vpop.xlane.xlu0 %297 }
 0x2ea   :  { %1681 = vrcp.f32 %v298_v48 }
 0x2f4   :  { %v1682_v49 = vpop.eup %1681 }
 0x2f5   :  { %v1891_v50 = vmul.f32 %v1682_v49, %v1680_v36 }
 0x2f7   :  { %v301_v52 = vpack.c.bf16 %v1891_v50, %v1891_v50 }
 0x2f9   :  { %1523 = vmatmul.mubr.msk.bf16.vlgmr.msra.gmra.mrb[8].mxu0 %vm289_vm3, %v301_v52 }
 0x2fa   :  { %1535 = vmatpush3.bf16.msra.mxu0 %v1896_v51  ;;  %1538 = vmatprep.mubr.msk.bf16.mxu0 %vm1720_vm0, %v1719_v1 }
 0x2fb   :  { %1536 = vmatprep.subr.bf16.mxu0 %v1719_v1 }
 0x2fe   :  { %1537 = vmatpush3.bf16.msra.mxu0 %v1905_v53 }
 0x2ff   :  { %1550 = vmatprep.subr.bf16.mxu0 %v1719_v1 }
 0x301   :  { %1539 = vmatmul.mubr.msk.bf16.vlgmr.msra.gmra.mrb[12].mxu0 %vm74_vm1, %v1806_v7  ;;  %v1976_v7 = vld [vmem:[%s2101_s5] sm:$0xff]   ;;  %s1722_s5 = smov [#allocation2]  }
 0x302   :  { %1552 = vmatprep.mubr.msk.bf16.mxu0 %vm1720_vm0, %v1719_v1  ;;  %s1345_s23 = sshll.u32 %s1722_s5, 4  ;;  %s1346_s23 = int_to_ptr.vmem [resolvable:$true] %s1345_s23 }
 0x303   :  { %s1695_s24 = scalar_lea.vmem %s1346_s23, 256  ;;  %p1700_p1 = scmp.lt.s32.totalorder %s1346_s23, %s1346_s23 }
 0x304   :  { %p1696_p0 = scmp.ne.s32.totalorder %s1346_s23, %s1695_s24  ;;  %p1701_p2 = scmp.lt.s32.totalorder %s1695_s24, %s1695_s24 }
 0x306   :  { %p1702_p3 = por %p1701_p2, %p1700_p1 }
 0x308   :  { %p1703_p4 = pnand %p1702_p3, %p1696_p0 }
 0x3cc   :  { %v1916_v58 = vpop.f32.mrb[8].mxu0 }
 0x3cd   :  { %v1524_v59 = vpop.f32.mrb[9].mxu0 }
 0x3ce   :  { %v347_v60 = vpop.f32.mrb[10].mxu0 }
 0x3cf   :  { %v1525_v61 = vpop.f32.mrb[11].mxu0 }
 0x3d4   :  { %v484_v63 = vpop.f32.mrb[12].mxu0 }
 0x3d5   :  { %v485_v4 = vadd.f32 %v1921_v62, %v484_v63  ;;  %v1540_v6 = vpop.f32.mrb[13].mxu0 }
 0x3d6   :  { %v487_v10 = vpop.f32.mrb[14].mxu0 }
 0x3d7   :  { %v549_v12 = vpack.c.bf16 %v485_v4, %v485_v4  ;;  %v1541_v13 = vpop.f32.mrb[15].mxu0 }
 0x3d9   :  { %v554_v15 = vsel %vm242_vm2, %v549_v12, 0 }
 0x3da   :  { %1551 = vmatpush3.bf16.xpose.msra.mxu0 %v554_v15 }
 0x3db   :  { %1562 = vmatprep.subr.bf16.mxu0 %v1719_v1 }
 0x3e1   :  { %1553 = vmatmul.mubr.msk.bf16.vlgmr.msra.gmra.mrb[16].mxu0 %vm242_vm2, %v548_v17 }
 0x3e2   :  { %1564 = vmatprep.mubr.msk.bf16.mxu0 %vm1720_vm0, %v1719_v1  ;;  %1563 = vmatpush3.bf16.msra.mxu0 %v1968_v42 }
 0x3e3   :  { %1574 = vmatprep.subr.bf16.mxu0 %v1719_v1 }
 0x4b4   :  { %v590_v20 = vpop.f32.mrb[16].mxu0 }
 0x4b5   :  { %v1554_v21 = vpop.f32.mrb[17].mxu0  ;;  %v596_v22 = vsel %vm289_vm3, %v590_v20, -inf }
 0x4b6   :  { %597 = vmax.xlane.f32.xlu1 %v596_v22  ;;  %v593_v23 = vpop.f32.mrb[18].mxu0 }
 0x4b7   :  { %v1555_v26 = vpop.f32.mrb[19].mxu0 }
 0x543   :  { %v598_v36 = vpop.xlane.xlu1 %597 }
 0x544   :  { %v599_v37 = vsub.f32 %v590_v20, %v598_v36 }
 0x546   :  { %v600_v38 = vmul.f32 1.442695, %v599_v37 }
 0x548   :  { %1683 = vpow2.f32 %v600_v38 }
 0x552   :  { %v1684_v39 = vpop.eup %1683 }
 0x553   :  { %v602_v40 = vsel %vm289_vm3, %v1684_v39, 0.0 }
 0x554   :  { %603 = vadd.xlane.f32.xlu1 %v602_v40 }
 0x565   :  { %767 = vrot.lane.b32.xlu1 %v1810_v8, %s1721_s4 }
 0x569   :  { %859 = vrot.lane.b32.xlu1 %v1855_v27, %s1721_s4  ;;  %v350_v27 = vpack.c.bf16 %v1916_v58, %v1916_v58 }
 0x5e1   :  { %v604_v43 = vpop.xlane.xlu1 %603 }
 0x5e2   :  { %1685 = vrcp.f32 %v604_v43 }
 0x5e5   :  { %v768_v57 = vpop.permute.xlu1 %767 }
 0x5ec   :  { %v1686_v44 = vpop.eup %1685 }
 0x5ed   :  { %v606_v45 = vmul.f32 %v1686_v44, %v1684_v39 }
 0x5ef   :  { %v607_v8 = vpack.c.bf16 %v606_v45, %v606_v45  ;;  %v757_v48 = vadd.f32 %v606_v45, %v1891_v50  ;;  %v1993_v50 = vpop.permute.xlu0 %813 }
 0x5f1   :  { %1559 = vmatmul.mubr.msk.bf16.vlgmr.msra.gmra.mrb[16].mxu1 %vm289_vm3, %v607_v8  ;;  %v765_v49 = vmul.f32 0.5, %v757_v48 }
 0x5f2   :  { %1569 = vmatpush3.bf16.msra.mxu1 %v1976_v7  ;;  %1570 = vmatprep.mubr.msk.bf16.mxu1 %vm1720_vm0, %v1719_v1 }
 0x5f3   :  { %1582 = vmatprep.subr.bf16.mxu1 %v1719_v1  ;;  %1336 = vst.msk [vmem:[#allocation2] sm:$0xff] %vm289_vm3, %v765_v49 }
 0x5f9   :  { %1571 = vmatmul.mubr.msk.bf16.vlgmr.msra.gmra.mrb[20].mxu1 %vm242_vm2, %v350_v27 }
 0x5fa   :  { %1583 = vmatpush3.bf16.msra.mxu1 %v1774_v0  ;;  %1586 = vmatprep.mubr.msk.bf16.mxu1 %vm1720_vm0, %v1719_v1 }
 0x5fb   :  { %1584 = vmatprep.subr.bf16.mxu1 %v1719_v1 }
 0x5fe   :  { %1585 = vmatpush3.bf16.msra.mxu1 %v1781_v2 }
 0x5ff   :  { %1598 = vmatprep.subr.bf16.mxu1 %v1719_v1 }
 0x601   :  { %1587 = vmatmul.mubr.msk.bf16.vlgmr.msra.gmra.mrb[24].mxu1 %vm74_vm1, %v1993_v50 }
 0x602   :  { %1600 = vmatprep.mubr.msk.bf16.mxu1 %vm1720_vm0, %v1719_v1 }
 0x6c4   :  { %v649_v52 = vpop.f32.mrb[16].mxu1 }
 0x6c5   :  { %v655_v54 = vpack.c.bf16 %v649_v52, %v649_v52  ;;  %v1560_v0 = vpop.f32.mrb[17].mxu1 }
 0x6c6   :  { %v652_v55 = vpop.f32.mrb[18].mxu1 }
 0x6c7   :  { %v1561_v56 = vpop.f32.mrb[19].mxu1  ;;  %1565 = vmatmul.mubr.msk.bf16.vlgmr.msra.gmra.mrb[20].mxu0 %vm242_vm2, %v655_v54 }
 0x6c8   :  { %1575 = vmatpush3.bf16.msra.mxu0 %v1787_v3  ;;  %1578 = vmatprep.mubr.msk.bf16.mxu0 %vm1720_vm0, %v1719_v1 }
 0x6c9   :  { %1576 = vmatprep.subr.bf16.mxu0 %v1719_v1 }
 0x6cc   :  { %v751_v2 = vpop.f32.mrb[20].mxu1  ;;  %1577 = vmatpush3.bf16.msra.mxu0 %v1801_v5 }
 0x6cd   :  { %v1572_v58 = vpop.f32.mrb[21].mxu1  ;;  %1590 = vmatprep.subr.bf16.mxu0 %v1719_v1 }
 0x6ce   :  { %v754_v59 = vpop.f32.mrb[22].mxu1 }
 0x6cf   :  { %v1573_v60 = vpop.f32.mrb[23].mxu1  ;;  %1579 = vmatmul.mubr.msk.bf16.vlgmr.msra.gmra.mrb[24].mxu0 %vm74_vm1, %v768_v57 }
 0x6d0   :  { %1591 = vmatpush3.bf16.msra.mxu0 %v1843_v24  ;;  %1594 = vmatprep.mubr.msk.bf16.mxu0 %vm1720_vm0, %v1719_v1 }
 0x6d1   :  { %1592 = vmatprep.subr.bf16.mxu0 %v1719_v1 }
 0x6d4   :  { %v852_v3 = vpop.f32.mrb[24].mxu1  ;;  %1593 = vmatpush3.bf16.msra.mxu0 %v1849_v25 }
 0x6d5   :  { %v853_v5 = vadd.f32 %v1826_v9, %v852_v3  ;;  %v1588_v61 = vpop.f32.mrb[25].mxu1  ;;  %1604 = vmatprep.subr.bf16.mxu0 %v1719_v1 }
 0x6d6   :  { %v855_v63 = vpop.f32.mrb[26].mxu1 }
 0x6d7   :  { %v905_v4 = vpack.c.bf16 %v853_v5, %v853_v5  ;;  %v1589_v6 = vpop.f32.mrb[27].mxu1 }
 0x6d9   :  { %v910_v10 = vsel %vm242_vm2, %v905_v4, 0 }
 0x6da   :  { %1599 = vmatpush3.bf16.xpose.msra.mxu1 %v910_v10 }
 0x6db   :  { %1610 = vmatprep.subr.bf16.mxu1 %v1719_v1 }
 0x79a   :  { %v702_v24 = vpop.f32.mrb[20].mxu0 }
 0x79b   :  { %v2017_v12 = vadd.f32 %v751_v2, %v702_v24  ;;  %v1566_v13 = vpop.f32.mrb[21].mxu0 }
 0x79c   :  { %v705_v15 = vpop.f32.mrb[22].mxu0 }
 0x79d   :  { %v1567_v16 = vpop.f32.mrb[23].mxu0 }
 0x7a2   :  { %v806_v25 = vpop.f32.mrb[24].mxu0 }
 0x7a3   :  { %v807_v9 = vadd.f32 %v1832_v14, %v806_v25  ;;  %v1580_v17 = vpop.f32.mrb[25].mxu0  ;;  %v860_v14 = vpop.permute.xlu1 %859 }
 0x7a4   :  { %v809_v20 = vpop.f32.mrb[26].mxu0  ;;  %1595 = vmatmul.mubr.msk.bf16.vlgmr.msra.gmra.mrb[28].mxu0 %vm74_vm1, %v860_v14 }
 0x7a5   :  { %v904_v21 = vpack.c.bf16 %v807_v9, %v807_v9  ;;  %v1581_v22 = vpop.f32.mrb[27].mxu0  ;;  %1606 = vmatprep.mubr.msk.bf16.mxu0 %vm1720_vm0, %v1719_v1 }
 0x7a7   :  { %1601 = vmatmul.mubr.msk.bf16.vlgmr.msra.gmra.mrb[28].mxu1 %vm242_vm2, %v904_v21 }
 0x7a8   :  { %1611 = vmatpush3.bf16.msra.mxu1 %v1876_v46  ;;  %1614 = vmatprep.mubr.msk.bf16.mxu1 %vm1720_vm0, %v1719_v1 }
 0x7a9   :  { %1612 = vmatprep.subr.bf16.mxu1 %v1719_v1 }
 0x7ac   :  { %1613 = vmatpush3.bf16.msra.mxu1 %v1883_v47 }
 0x7ad   :  { %1626 = vmatprep.subr.bf16.mxu1 %v1719_v1 }
 0x7af   :  { %1615 = vmatmul.mubr.msk.bf16.vlgmr.msra.gmra.mrb[32].mxu1 %vm74_vm1, %v768_v57 }
 0x7b0   :  { %1627 = vmatpush3.bf16.msra.mxu1 %v1938_v18  ;;  %1630 = vmatprep.mubr.msk.bf16.mxu1 %vm1720_vm0, %v1719_v1 }
 0x7b1   :  { %1628 = vmatprep.subr.bf16.mxu1 %v1719_v1 }
 0x7b4   :  { %1629 = vmatpush3.bf16.msra.mxu1 %v1944_v19 }
 0x7b5   :  { %1640 = vmatprep.subr.bf16.mxu1 %v1719_v1 }
 0x7b7   :  { %1631 = vmatmul.mubr.msk.bf16.vlgmr.msra.gmra.mrb[36].mxu1 %vm74_vm1, %v860_v14 }
 0x7b8   :  { %1642 = vmatprep.mubr.msk.bf16.mxu1 %vm1720_vm0, %v1719_v1 }
 0x877   :  { %v898_v32 = vpop.f32.mrb[28].mxu0 }
 0x878   :  { %v899_v34 = vadd.f32 %v1868_v41, %v898_v32  ;;  %v1596_v36 = vpop.f32.mrb[29].mxu0 }
 0x879   :  { %v901_v38 = vpop.f32.mrb[30].mxu0 }
 0x87a   :  { %v946_v46 = vpop.f32.mrb[28].mxu1  ;;  %v964_v40 = vpack.c.bf16 %v899_v34, %v899_v34  ;;  %v1597_v44 = vpop.f32.mrb[31].mxu0 }
 0x87b   :  { %v1602_v47 = vpop.f32.mrb[29].mxu1  ;;  %v952_v18 = vsel %vm289_vm3, %v946_v46, -inf }
 0x87c   :  { %953 = vmax.xlane.f32.xlu1 %v952_v18  ;;  %v949_v23 = vpop.f32.mrb[30].mxu1  ;;  %v969_v8 = vsel %vm306_vm4, %v964_v40, 0 }
 0x87d   :  { %v1603_v19 = vpop.f32.mrb[31].mxu1  ;;  %1605 = vmatpush3.bf16.msra.mxu0 %v969_v8 }
 0x87e   :  { %1618 = vmatprep.subr.bf16.mxu0 %v1719_v1 }
 0x882   :  { %v1046_v26 = vpop.f32.mrb[32].mxu1 }
 0x883   :  { %v1616_v29 = vpop.f32.mrb[33].mxu1  ;;  %v1047_v4 = vadd.f32 %v1927_v11, %v1046_v26 }
 0x884   :  { %v1049_v30 = vpop.f32.mrb[34].mxu1 }
 0x885   :  { %v1617_v31 = vpop.f32.mrb[35].mxu1 }
 0x88a   :  { %v1126_v33 = vpop.f32.mrb[36].mxu1 }
 0x88b   :  { %v1127_v35 = vadd.f32 %v1957_v28, %v1126_v33  ;;  %v1632_v37 = vpop.f32.mrb[37].mxu1 }
 0x88c   :  { %v1129_v39 = vpop.f32.mrb[38].mxu1 }
 0x88d   :  { %v1192_v43 = vpack.c.bf16 %v1127_v35, %v1127_v35  ;;  %v1633_v45 = vpop.f32.mrb[39].mxu1 }
 0x88f   :  { %v1197_v48 = vsel %vm306_vm4, %v1192_v43, 0 }
 0x890   :  { %1641 = vmatpush3.bf16.msra.mxu1 %v1197_v48 }
 0x891   :  { %1652 = vmatprep.subr.bf16.mxu1 %v1719_v1 }
 0x909   :  { %v954_v41 = vpop.xlane.xlu1 %953 }
 0x90a   :  { %v955_v28 = vsub.f32 %v946_v46, %v954_v41 }
 0x90c   :  { %v956_v49 = vmul.f32 1.442695, %v955_v28 }
 0x90e   :  { %1687 = vpow2.f32 %v956_v49 }
 0x918   :  { %v1688_v27 = vpop.eup %1687 }
 0x919   :  { %v958_v52 = vsel %vm289_vm3, %v1688_v27, 0.0 }
 0x91a   :  { %959 = vadd.xlane.f32.xlu0 %v958_v52 }
 0x9a7   :  { %v960_v54 = vpop.xlane.xlu0 %959 }
 0x9a8   :  { %1689 = vrcp.f32 %v960_v54 }
 0x9b2   :  { %v1690_v0 = vpop.eup %1689 }
 0x9b3   :  { %v962_v55 = vmul.f32 %v1690_v0, %v1688_v27 }
 0x9b5   :  { %v963_v56 = vpack.c.bf16 %v962_v55, %v962_v55 }
 0x9b7   :  { %1607 = vmatmul.mubr.msk.bf16.vlgmr.msra.gmra.mrb[32].mxu0 %vm289_vm3, %v963_v56 }
 0x9b8   :  { %1619 = vmatpush3.bf16.msra.mxu0 %v1896_v51  ;;  %1622 = vmatprep.mubr.msk.bf16.mxu0 %vm1720_vm0, %v1719_v1 }
 0x9b9   :  { %1620 = vmatprep.subr.bf16.mxu0 %v1719_v1 }
 0x9bc   :  { %1621 = vmatpush3.bf16.msra.mxu0 %v1905_v53 }
 0x9bd   :  { %1634 = vmatprep.subr.bf16.mxu0 %v1719_v1 }
 0x9bf   :  { %1623 = vmatmul.mubr.msk.bf16.vlgmr.msra.gmra.mrb[36].mxu0 %vm74_vm1, %v1993_v50  ;;  %v1132_v50 = vpack.c.bf16 %v1047_v4, %v1047_v4 }
 0x9c0   :  { %1636 = vmatprep.mubr.msk.bf16.mxu0 %vm1720_vm0, %v1719_v1 }
 0xa8a   :  { %v1005_v2 = vpop.f32.mrb[32].mxu0 }
 0xa8b   :  { %v1608_v57 = vpop.f32.mrb[33].mxu0  ;;  %v1011_v46 = vpack.c.bf16 %v1005_v2, %v1005_v2 }
 0xa8c   :  { %v1008_v58 = vpop.f32.mrb[34].mxu0 }
 0xa8d   :  { %v1609_v59 = vpop.f32.mrb[35].mxu0 }
 0xa92   :  { %v1086_v51 = vpop.f32.mrb[36].mxu0 }
 0xa93   :  { %v1087_v60 = vadd.f32 %v1921_v62, %v1086_v51  ;;  %v1624_v3 = vpop.f32.mrb[37].mxu0 }
 0xa94   :  { %v1089_v5 = vpop.f32.mrb[38].mxu0 }
 0xa95   :  { %v1133_v61 = vpack.c.bf16 %v1087_v60, %v1087_v60  ;;  %v1625_v63 = vpop.f32.mrb[39].mxu0 }
 0xa97   :  { %v1138_v53 = vsel %vm242_vm2, %v1133_v61, 0 }
 0xa98   :  { %1635 = vmatpush3.bf16.xpose.msra.mxu0 %v1138_v53 }
 0xa99   :  { %1646 = vmatprep.subr.bf16.mxu0 %v1719_v1 }
 0xa9f   :  { %1637 = vmatmul.mubr.msk.bf16.vlgmr.msra.gmra.mrb[40].mxu0 %vm242_vm2, %v1132_v50 }
 0xaa0   :  { %1647 = vmatpush3.bf16.msra.mxu0 %v1968_v42  ;;  %1648 = vmatprep.mubr.msk.bf16.mxu0 %vm1720_vm0, %v1719_v1 }
 0xb72   :  { %v1174_v62 = vpop.f32.mrb[40].mxu0 }
 0xb73   :  { %v1638_v6 = vpop.f32.mrb[41].mxu0  ;;  %v1180_v10 = vsel %vm289_vm3, %v1174_v62, -inf }
 0xb74   :  { %1181 = vmax.xlane.f32.xlu0 %v1180_v10  ;;  %v1177_v24 = vpop.f32.mrb[42].mxu0 }
 0xb75   :  { %v1639_v13 = vpop.f32.mrb[43].mxu0 }
 0xc01   :  { %v1182_v15 = vpop.xlane.xlu0 %1181 }
 0xc02   :  { %v1183_v16 = vsub.f32 %v1174_v62, %v1182_v15 }
 0xc04   :  { %v1184_v11 = vmul.f32 1.442695, %v1183_v16 }
 0xc06   :  { %1691 = vpow2.f32 %v1184_v11 }
 0xc10   :  { %v1692_v25 = vpop.eup %1691 }
 0xc11   :  { %v1186_v9 = vsel %vm289_vm3, %v1692_v25, 0.0 }
 0xc12   :  { %1187 = vadd.xlane.f32.xlu0 %v1186_v9 }
 0xc9f   :  { %v1188_v17 = vpop.xlane.xlu0 %1187 }
 0xca0   :  { %1693 = vrcp.f32 %v1188_v17 }
 0xcaa   :  { %v1694_v42 = vpop.eup %1693 }
 0xcab   :  { %v1190_v20 = vmul.f32 %v1694_v42, %v1692_v25 }
 0xcad   :  { %v1191_v21 = vpack.c.bf16 %v1190_v20, %v1190_v20  ;;  %v1326_v22 = vadd.f32 %v1190_v20, %v962_v55 }
 0xcaf   :  { %1643 = vmatmul.mubr.msk.bf16.vlgmr.msra.gmra.mrb[40].mxu1 %vm289_vm3, %v1191_v21  ;;  %v1328_v14 = vmul.f32 0.5, %v1326_v22 }
 0xcb0   :  { %1653 = vmatpush3.bf16.msra.mxu1 %v1976_v7  ;;  %1654 = vmatprep.mubr.msk.bf16.mxu1 %vm1720_vm0, %v1719_v1 }
 0xcb1   :  { %1337 = vst.msk [vmem:[#allocation2 + $0x8] sm:$0xff] %vm289_vm3, %v1328_v14 }
 0xcb7   :  { %1655 = vmatmul.mubr.msk.bf16.vlgmr.msra.gmra.mrb[44].mxu1 %vm242_vm2, %v1011_v46 }
 0xd82   :  { %v1233_v47 = vpop.f32.mrb[40].mxu1 }
 0xd83   :  { %v1239_v18 = vpack.c.bf16 %v1233_v47, %v1233_v47  ;;  %v1644_v23 = vpop.f32.mrb[41].mxu1 }
 0xd84   :  { %v1236_v19 = vpop.f32.mrb[42].mxu1 }
 0xd85   :  { %v1645_v26 = vpop.f32.mrb[43].mxu1  ;;  %1649 = vmatmul.mubr.msk.bf16.vlgmr.msra.gmra.mrb[44].mxu0 %vm242_vm2, %v1239_v18 }
 0xd8a   :  { %v1320_v29 = vpop.f32.mrb[44].mxu1 }
 0xd8b   :  { %v1656_v30 = vpop.f32.mrb[45].mxu1 }
 0xd8c   :  { %v1323_v31 = vpop.f32.mrb[46].mxu1 }
 0xd8d   :  { %v1657_v32 = vpop.f32.mrb[47].mxu1 }
 0xd8e   :  { %1706 = shalt.err (!%p1703_p4)
}
 0xd8f   :  { %s1707_s26 = scalar_lea.hbm %s2104_s8, 256 }
 0xd90   :  { %p1708_p5 = scmp.ne.s32.totalorder %s2104_s8, %s1707_s26  ;;  %p1711_p6 = scmp.lt.u32.totalorder %s1707_s26, %s2104_s8 }
 0xd92   :  { %p1713_p7 = pnand %p1711_p6, %p1708_p5 }
 0xd94   :  { %1716 = shalt.err (!%p1713_p7)
}
 0xd95   :  { %s1723_s9 = smov 128   ;;  %s1724_s10 = smov 8   ;;  %v1417_v34 = vld [vmem:[%s2102_s6] ss:$0 sm:$0xff]  ;;  %vm1334_vm5 = vcmask 523264  }
 0xd96   :  { %1351 = dma.vmem_to_hbm [thread:$0]  %s1346_s23, 256, %s2104_s8, [#allocation3], %s1723_s9, %s1723_s9, %s1724_s10   ;;  %v764_v38 = vadd.f32 %v1417_v34, %v2017_v12 }
 0xd97   :  { %s1725_s15 = smov 32  }
 0xe58   :  { %v1277_v1 = vpop.f32.mrb[44].mxu0 }
 0xe59   :  { %v1321_v7 = vadd.f32 %v1320_v29, %v1277_v1  ;;  %v1650_v33 = vpop.f32.mrb[45].mxu0 }
 0xe5a   :  { %v1280_v35 = vpop.f32.mrb[46].mxu0 }
 0xe5b   :  { %v1327_v36 = vadd.f32 %v1417_v34, %v1321_v7  ;;  %v1651_v37 = vpop.f32.mrb[47].mxu0 }
 0xe5d   :  { %1330 = vrot.lane.b32.xlu1 %v1327_v36, %s1725_s15 }
 0xecf   :  { %v1331_v39 = vpop.permute.xlu1 %1330 }
 0xed0   :  { %v1333_v40 = vsel %vm74_vm1, %v764_v38, %v1331_v39 }
 0xed1   :  { %1335 = vst.msk [vmem:[%s2103_s7] sm:$0xff] %vm1334_vm5, %v1333_v40 }
 0xed2   :  { %1717 = dma.done.wait [#allocation3], 256  }
 0xed3   :  { %1718 = vsyncadd [#allocation3], 4294967040 }
 0xed4   :  { %1357 = vsyncpa [#allocation3], 1 }

</bundles_post_ra>
